<compile_context>
chip_gen: v7x
topology: tpu7x:2x2x1
jax: 0.10.0
libtpu: 0.0.40
codegen_flags: <defaults>
</compile_context>

<pallas_src>
import jax
import jax.numpy as jnp
import numpy as np
from jax.experimental import pallas as pl
from jax.experimental.pallas import tpu as pltpu

EPS = 1e-5          # nn.InstanceNorm2d default eps
NEG_SLOPE = 0.2     # LeakyReLU slope


def _round_up(x, m):
    return (x + m - 1) // m * m


def _disc_block_kernel(patch_ref, w_ref, o_ref, sum_ref, ssq_ref):
    """grid = (N, P//TP); P axis is the inner 'arbitrary' axis.

    patch_ref: (TP, Kp)  matmul dtype (bf16 by default)
    w_ref:     (Kp, Cp)  matmul dtype
    o_ref:     (P, Cp)   f32, resident across the P axis (constant block index)
    sum_ref:   (1, Cp)   f32 running per-channel sum
    ssq_ref:   (1, Cp)   f32 running per-channel sum of squares
    """
    p = pl.program_id(1)
    tp = patch_ref.shape[0]
    P = o_ref.shape[0]

    @pl.when(p == 0)
    def _():
        sum_ref[...] = jnp.zeros_like(sum_ref)
        ssq_ref[...] = jnp.zeros_like(ssq_ref)

    # Convolution tile as an MXU matmul, f32 accumulation.
    y = jnp.dot(patch_ref[...], w_ref[...], preferred_element_type=jnp.float32)  # (TP, Cp)

    # Running stats in one sweep over y (var = E[y^2] - mean^2).
    sum_ref[...] += jnp.sum(y, axis=0, keepdims=True)
    ssq_ref[...] += jnp.sum(y * y, axis=0, keepdims=True)

    # Stash this tile's conv output into the resident output block.
    row0 = pl.multiple_of(p * tp, tp)
    o_ref[pl.ds(row0, tp), :] = y

    @pl.when(p == pl.num_programs(1) - 1)
    def _():
        inv_p = jnp.float32(1.0 / P)
        mean = sum_ref[...] * inv_p                                  # (1, Cp)
        var = jnp.maximum(ssq_ref[...] * inv_p - mean * mean, 0.0)   # biased variance
        scale = jax.lax.rsqrt(var + jnp.float32(EPS))
        z = (o_ref[...] - mean) * scale
        o_ref[...] = jnp.where(z >= 0, z, jnp.float32(NEG_SLOPE) * z)


def discriminator_block(x, weight, bias=None, stride=2,
                        matmul_dtype=jnp.bfloat16, channels_last=False):
    """x: (N, C_in, H, W). weight: (C_out, C_in, 4, 4). bias accepted but unused:
    a per-channel conv bias cancels exactly under InstanceNorm2d(affine=False)."""
    del bias

    N, C_in, H, W = x.shape
    C_out, _, kh, kw = weight.shape
    pad = 1
    Ho = (H + 2 * pad - kh) // stride + 1
    Wo = (W + 2 * pad - kw) // stride + 1
    P = Ho * Wo
    K = C_in * kh * kw

    # --- plain-JAX glue: reflect pad + im2col, emitted directly in (N, P, K) order ---
    # TODO(synk): move reflect-pad + patch extraction into the kernel (manual DMA of
    # overlapping padded rows per P tile) to avoid the ~16x im2col HBM blow-up.
    x_nhwc = jnp.transpose(x, (0, 2, 3, 1))                          # 1x-sized transpose
    xp = jnp.pad(x_nhwc, ((0, 0), (pad, pad), (pad, pad), (0, 0)), mode="reflect")
    slabs = []
    for ki in range(kh):
        for kj in range(kw):
            slabs.append(xp[:, ki:ki + stride * Ho:stride,
                            kj:kj + stride * Wo:stride, :])          # (N, Ho, Wo, C_in)
    patches = jnp.stack(slabs, axis=-1)                              # (N, Ho, Wo, C_in, kh*kw)
    patches = patches.reshape(N, P, K)                               # K order = (ci, ki, kj)

    w_mat = jnp.transpose(weight.reshape(C_out, K))                  # (K, C_out), same K order

    # Lane-dense padding: K and C_out up to multiples of 128 (zero rows/cols are inert).
    Kp = _round_up(K, 128)
    Cp = _round_up(C_out, 128)
    if Kp != K:
        patches = jnp.pad(patches, ((0, 0), (0, 0), (0, Kp - K)))
        w_mat = jnp.pad(w_mat, ((0, Kp - K), (0, 0)))
    if Cp != C_out:
        w_mat = jnp.pad(w_mat, ((0, 0), (0, Cp - C_out)))

    patches = patches.astype(matmul_dtype)
    w_mat = w_mat.astype(matmul_dtype)

    # P tile: biggest MXU-friendly divisor of P (multiple of 8; full P as fallback).
    TP = P
    for cand in (512, 256, 128, 64, 32, 16, 8):
        if P % cand == 0:
            TP = cand
            break

    out = pl.pallas_call(
        _disc_block_kernel,
        out_shape=jax.ShapeDtypeStruct((N, P, Cp), jnp.float32),
        grid_spec=pltpu.PrefetchScalarGridSpec(
            num_scalar_prefetch=0,
            grid=(N, P // TP),
            in_specs=[
                pl.BlockSpec((pl.Squeezed(), TP, Kp), lambda n, p: (n, p, 0)),
                pl.BlockSpec((Kp, Cp), lambda n, p: (0, 0)),
            ],
            out_specs=pl.BlockSpec((pl.Squeezed(), P, Cp), lambda n, p: (n, 0, 0)),
            scratch_shapes=[
                pltpu.VMEM((1, Cp), jnp.float32),   # running channel sum
                pltpu.VMEM((1, Cp), jnp.float32),   # running channel sum of squares
            ],
        ),
        compiler_params=pltpu.CompilerParams(
            dimension_semantics=("parallel", "arbitrary"),
            vmem_limit_bytes=48 * 1024 * 1024,
        ),
    )(patches, w_mat)

    out = out[..., :C_out].astype(x.dtype).reshape(N, Ho, Wo, C_out)
    if channels_last:
        return out                                   # NHWC: skips the final layout transpose
    return jnp.transpose(out, (0, 3, 1, 2))          # NCHW to match the PyTorch module


def _reference(x, weight, bias, stride=2):
    """Pure-JAX reference of the PyTorch forward (bias included, f32 end-to-end)."""
    xp = jnp.pad(x, ((0, 0), (0, 0), (1, 1), (1, 1)), mode="reflect")
    y = jax.lax.conv_general_dilated(
        xp, weight, (stride, stride), "VALID",
        dimension_numbers=("NCHW", "OIHW", "NCHW"))
    y = y + bias.reshape(1, -1, 1, 1)
    mean = jnp.mean(y, axis=(2, 3), keepdims=True)
    var = jnp.mean((y - mean) ** 2, axis=(2, 3), keepdims=True)
    y = (y - mean) / jnp.sqrt(var + EPS)
    return jnp.where(y >= 0, y, NEG_SLOPE * y)


if __name__ == "__main__":
    key = jax.random.PRNGKey(0)
    kx, kw_, kb = jax.random.split(key, 3)

    N, C_in, H, W = 2, 4, 16, 16
    C_out = 8

    x = jax.random.normal(kx, (N, C_in, H, W), dtype=jnp.float32)
    weight = jax.random.normal(kw_, (C_out, C_in, 4, 4), dtype=jnp.float32) * 0.1
    bias = jax.random.normal(kb, (C_out,), dtype=jnp.float32) * 0.1

    ref = _reference(x, weight, bias)

    # f32-operand path: tight numerical check of the kernel math.
    out_f32 = jax.block_until_ready(
        discriminator_block(x, weight, bias, matmul_dtype=jnp.float32))
    assert out_f32.shape == (N, C_out, 8, 8), out_f32.shape
    np.testing.assert_allclose(np.asarray(out_f32), np.asarray(ref), atol=2e-3, rtol=2e-3)

    # Default bf16-operand path (MXU-friendly); looser tolerance for bf16 rounding.
    out_bf16 = jax.block_until_ready(discriminator_block(x, weight, bias))
    assert out_bf16.shape == (N, C_out, 8, 8), out_bf16.shape
    np.testing.assert_allclose(np.asarray(out_bf16), np.asarray(ref), atol=5e-2, rtol=5e-2)

    print("KERNEL_OK")
</pallas_src>

<mosaic_0001>
module attributes {stable_mosaic.version = 11 : i64} {
  func.func @_disc_block_kernel(%arg0: i32, %arg1: i32, %arg2: memref<1x64x128xf32, #tpu.memory_space<vmem>>, %arg3: memref<128x128xf32, #tpu.memory_space<vmem>>, %arg4: memref<1x64x128xf32, #tpu.memory_space<vmem>>, %arg5: memref<1x128xf32, #tpu.memory_space<vmem>>, %arg6: memref<1x128xf32, #tpu.memory_space<vmem>>) attributes {dimension_semantics = [#tpu.dimension_semantics<parallel>, #tpu.dimension_semantics<arbitrary>], iteration_bounds = array<i64: 2, 1>, scalar_prefetch = 0 : i64, scratch_operands = 2 : i64, tpu.core_type = #tpu.core_type<tc>, window_params = [{transform_indices = @transform_0, window_bounds = array<i64: 1, 64, 128>}, {pipeline_mode = #tpu.pipeline_mode<synchronous>, transform_indices = @transform_1, window_bounds = array<i64: 128, 128>}, {transform_indices = @transform_2, window_bounds = array<i64: 1, 64, 128>}]} {
    %c0_i32 = arith.constant 0 : i32
    %0 = arith.cmpi eq, %arg1, %c0_i32 : i32
    %1 = arith.extui %0 : i1 to i32
    %c0_i32_0 = arith.constant 0 : i32
    %2 = arith.cmpi ne, %1, %c0_i32_0 : i32
    scf.if %2 {
      %cst_19 = arith.constant 0.000000e+00 : f32
      %27 = vector.broadcast %cst_19 : f32 to vector<1x128xf32>
      %c0_20 = arith.constant 0 : index
      %c0_21 = arith.constant 0 : index
      %28 = vector.load %arg5[%c0_20, %c0_21] : memref<1x128xf32, #tpu.memory_space<vmem>>, vector<1x128xf32>
      tpu.vector_store %arg5[%c0_20, %c0_21], %27 {strides = array<i32>} : memref<1x128xf32, #tpu.memory_space<vmem>>, vector<1x128xf32>,
      %cst_22 = arith.constant 0.000000e+00 : f32
      %29 = vector.broadcast %cst_22 : f32 to vector<1x128xf32>
      %c0_23 = arith.constant 0 : index
      %c0_24 = arith.constant 0 : index
      %30 = vector.load %arg6[%c0_23, %c0_24] : memref<1x128xf32, #tpu.memory_space<vmem>>, vector<1x128xf32>
      tpu.vector_store %arg6[%c0_23, %c0_24], %29 {strides = array<i32>} : memref<1x128xf32, #tpu.memory_space<vmem>>, vector<1x128xf32>,
    } else {
    }
    %c0 = arith.constant 0 : index
    %c0_1 = arith.constant 0 : index
    %c0_2 = arith.constant 0 : index
    %3 = vector.load %arg2[%c0, %c0_1, %c0_2] : memref<1x64x128xf32, #tpu.memory_space<vmem>>, vector<1x64x128xf32>
    %4 = vector.shape_cast %3 : vector<1x64x128xf32> to vector<64x128xf32>
    %c0_3 = arith.constant 0 : index
    %c0_4 = arith.constant 0 : index
    %5 = vector.load %arg3[%c0_3, %c0_4] : memref<128x128xf32, #tpu.memory_space<vmem>>, vector<128x128xf32>
    %cst = arith.constant dense<0.000000e+00> : vector<64x128xf32>
    %6 = tpu.matmul %4, %5, %cst {dimension_numbers = #tpu.dot_dimension_numbers<[1], [0], [0], [1], [0, 0, 1, 1], [], []>} : vector<64x128xf32>, vector<128x128xf32>, vector<64x128xf32> -> vector<64x128xf32>
    %c0_5 = arith.constant 0 : index
    %c0_6 = arith.constant 0 : index
    %7 = vector.load %arg5[%c0_5, %c0_6] : memref<1x128xf32, #tpu.memory_space<vmem>>, vector<1x128xf32>
    %cst_7 = arith.constant dense<0.000000e+00> : vector<128xf32>
    %8 = vector.multi_reduction <add>, %6, %cst_7 [0] : vector<64x128xf32> to vector<128xf32>
    %9 = vector.shape_cast %8 : vector<128xf32> to vector<1x128xf32>
    %10 = arith.addf %7, %9 : vector<1x128xf32>
    %c0_8 = arith.constant 0 : index
    %c0_9 = arith.constant 0 : index
    %11 = vector.load %arg5[%c0_8, %c0_9] : memref<1x128xf32, #tpu.memory_space<vmem>>, vector<1x128xf32>
    tpu.vector_store %arg5[%c0_8, %c0_9], %10 {strides = array<i32>} : memref<1x128xf32, #tpu.memory_space<vmem>>, vector<1x128xf32>,
    %c0_10 = arith.constant 0 : index
    %c0_11 = arith.constant 0 : index
    %12 = vector.load %arg6[%c0_10, %c0_11] : memref<1x128xf32, #tpu.memory_space<vmem>>, vector<1x128xf32>
    %13 = arith.mulf %6, %6 : vector<64x128xf32>
    %cst_12 = arith.constant dense<0.000000e+00> : vector<128xf32>
    %14 = vector.multi_reduction <add>, %13, %cst_12 [0] : vector<64x128xf32> to vector<128xf32>
    %15 = vector.shape_cast %14 : vector<128xf32> to vector<1x128xf32>
    %16 = arith.addf %12, %15 : vector<1x128xf32>
    %c0_13 = arith.constant 0 : index
    %c0_14 = arith.constant 0 : index
    %17 = vector.load %arg6[%c0_13, %c0_14] : memref<1x128xf32, #tpu.memory_space<vmem>>, vector<1x128xf32>
    tpu.vector_store %arg6[%c0_13, %c0_14], %16 {strides = array<i32>} : memref<1x128xf32, #tpu.memory_space<vmem>>, vector<1x128xf32>,
    %c64_i32 = arith.constant 64 : i32
    %18 = arith.muli %arg1, %c64_i32 : i32
    %19 = tpu.assume_multiple %18, 64 : i32
    %c0_15 = arith.constant 0 : index
    %20 = arith.index_cast %19 : i32 to index
    %c0_16 = arith.constant 0 : index
    %21 = vector.load %arg4[%c0_15, %20, %c0_16] : memref<1x64x128xf32, #tpu.memory_space<vmem>>, vector<1x64x128xf32>
    %22 = vector.shape_cast %21 : vector<1x64x128xf32> to vector<64x128xf32>
    %23 = vector.shape_cast %6 : vector<64x128xf32> to vector<1x64x128xf32>
    tpu.vector_store %arg4[%c0_15, %20, %c0_16], %23 {strides = array<i32>} : memref<1x64x128xf32, #tpu.memory_space<vmem>>, vector<1x64x128xf32>,
    %c0_i32_17 = arith.constant 0 : i32
    %24 = arith.cmpi eq, %arg1, %c0_i32_17 : i32
    %25 = arith.extui %24 : i1 to i32
    %c0_i32_18 = arith.constant 0 : i32
    %26 = arith.cmpi ne, %25, %c0_i32_18 : i32
    scf.if %26 {
      %c0_19 = arith.constant 0 : index
      %c0_20 = arith.constant 0 : index
      %27 = vector.load %arg5[%c0_19, %c0_20] : memref<1x128xf32, #tpu.memory_space<vmem>>, vector<1x128xf32>
      %cst_21 = arith.constant 1.562500e-02 : f32
      %28 = vector.broadcast %cst_21 : f32 to vector<1x128xf32>
      %29 = arith.mulf %27, %28 : vector<1x128xf32>
      %c0_22 = arith.constant 0 : index
      %c0_23 = arith.constant 0 : index
      %30 = vector.load %arg6[%c0_22, %c0_23] : memref<1x128xf32, #tpu.memory_space<vmem>>, vector<1x128xf32>
      %cst_24 = arith.constant 1.562500e-02 : f32
      %31 = vector.broadcast %cst_24 : f32 to vector<1x128xf32>
      %32 = arith.mulf %30, %31 : vector<1x128xf32>
      %33 = arith.mulf %29, %29 : vector<1x128xf32>
      %34 = arith.subf %32, %33 : vector<1x128xf32>
      %cst_25 = arith.constant 0.000000e+00 : f32
      %35 = vector.broadcast %cst_25 : f32 to vector<1x128xf32>
      %36 = arith.maximumf %34, %35 : vector<1x128xf32>
      %cst_26 = arith.constant 9.99999974E-6 : f32
      %37 = vector.broadcast %cst_26 : f32 to vector<1x128xf32>
      %38 = arith.addf %36, %37 : vector<1x128xf32>
      %39 = math.rsqrt %38 : vector<1x128xf32>
      %c0_27 = arith.constant 0 : index
      %c0_28 = arith.constant 0 : index
      %c0_29 = arith.constant 0 : index
      %40 = vector.load %arg4[%c0_27, %c0_28, %c0_29] : memref<1x64x128xf32, #tpu.memory_space<vmem>>, vector<1x64x128xf32>
      %41 = vector.shape_cast %40 : vector<1x64x128xf32> to vector<64x128xf32>
      %42 = vector.broadcast %29 : vector<1x128xf32> to vector<64x128xf32>
      %43 = arith.subf %41, %42 : vector<64x128xf32>
      %44 = vector.broadcast %39 : vector<1x128xf32> to vector<64x128xf32>
      %45 = arith.mulf %43, %44 : vector<64x128xf32>
      %cst_30 = arith.constant 0.000000e+00 : f32
      %46 = vector.broadcast %cst_30 : f32 to vector<64x128xf32>
      %47 = arith.cmpf oge, %45, %46 : vector<64x128xf32>
      %cst_31 = arith.constant 2.000000e-01 : f32
      %48 = vector.broadcast %cst_31 : f32 to vector<64x128xf32>
      %49 = arith.mulf %48, %45 : vector<64x128xf32>
      %50 = arith.select %47, %45, %49 : vector<64x128xi1>, vector<64x128xf32>
      %c0_32 = arith.constant 0 : index
      %c0_33 = arith.constant 0 : index
      %c0_34 = arith.constant 0 : index
      %51 = vector.load %arg4[%c0_32, %c0_33, %c0_34] : memref<1x64x128xf32, #tpu.memory_space<vmem>>, vector<1x64x128xf32>
      %52 = vector.shape_cast %51 : vector<1x64x128xf32> to vector<64x128xf32>
      %53 = vector.shape_cast %50 : vector<64x128xf32> to vector<1x64x128xf32>
      tpu.vector_store %arg4[%c0_32, %c0_33, %c0_34], %53 {strides = array<i32>} : memref<1x64x128xf32, #tpu.memory_space<vmem>>, vector<1x64x128xf32>,
    } else {
    }
    return
  }
  func.func @transform_0(%arg0: i32, %arg1: i32) -> (i32, i32, i32) {
    %c0_i32 = arith.constant 0 : i32
    %c0_i32_0 = arith.constant 0 : i32
    return %arg0, %arg1, %c0_i32 : i32, i32, i32
  }
  func.func @transform_1(%arg0: i32, %arg1: i32) -> (i32, i32) {
    %c0_i32 = arith.constant 0 : i32
    %c0_i32_0 = arith.constant 0 : i32
    %c0_i32_1 = arith.constant 0 : i32
    return %c0_i32, %c0_i32_0 : i32, i32
  }
  func.func @transform_2(%arg0: i32, %arg1: i32) -> (i32, i32, i32) {
    %c0_i32 = arith.constant 0 : i32
    %c0_i32_0 = arith.constant 0 : i32
    %c0_i32_1 = arith.constant 0 : i32
    return %arg0, %c0_i32, %c0_i32_0 : i32, i32, i32
  }
}

</mosaic_0001>

<bundles_post_ra>
// kernel: tpu_custom_call.1
= control target key start
LH: loop header
LB: loop body
LE: loop exit
PB: predicated region body
PF: predicated region fallthrough
CT: control target
= control target key end

     0   :  { %7 = vsyncpa [#allocation5], 0  ;;  %s1241_s0 = inlined_call_operand.hbm [shape: f32[2,64,128], index: 0, kind: input, shape index: {}]   ;;  %s1242_s1 = inlined_call_operand.hbm [shape: f32[128,128], index: 1, kind: input, shape index: {}]   ;;  %s1243_s2 = inlined_call_operand.hbm [shape: f32[2,64,128], index: 2, kind: output, shape index: {}]  }
   0x1   :  { %9 = vsyncpa [#allocation5 + $0x1], 0 }
   0x2   :  { %10 = vsyncpa [#allocation8], 0 }
   0x3   :  { %11 = vsyncpa [#allocation6], 0 }
   0x4   :  { %13 = vsyncpa [#allocation6 + $0x1], 0  ;;  %s953_s9 = smov 0   ;;  %s955_s10 = smov 0  }
   0x5   :  { %s957_s11 = smov 0   ;;  %s959_s12 = smov 0  }
   0x6   :  { %s961_s13 = smov 0   ;;  %s963_s14 = smov 0  }
   0x7 LB: > { %s569_s15 = sadd.s32 4294967295, %s928_s14   ;;  %s570_s16 = sadd.s32 4294967294, %s928_s14   ;;  %s928_s14 = sphi %s963_s14, %s19_s14   ;;  %s924_s13 = sphi %s961_s13, %s1267_s13   ;;  %s920_s12 = sphi %s959_s12, %s1266_s12   ;;  %s916_s11 = sphi %s957_s11, %s1265_s11   ;;  %s912_s10 = sphi %s955_s10, %s1264_s10   ;;  %s908_s9 = sphi %s953_s9, %s1263_s9  }
   0x8   : > { %p53_p0 = scmp.ne.s32.totalorder %s912_s10, %s908_s9  ;;  %p987_p1 = scmp.eq.s32.totalorder %s569_s15, 0 }
   0x9   : > { %p991_p2 = scmp.eq.s32.totalorder %s569_s15, 1  ;;  %p104_p3 = scmp.eq.s32.totalorder %s570_s16, 1 }
   0xa   : > { %s1248_s17 = scalar_select %p987_p1, 1, 0 }
   0xb   : > { %s1249_s18 = scalar_select %p991_p2, 1, 0 }
   0xc   : > { %p997_p4 = por %p987_p1, %p53_p0  ;;  %p571_p5 = scmp.ge.s32.totalorder %s928_s14, 1 }
   0xd   : > { %p1002_p6 = por %p104_p3, %p53_p0  ;;  %p111_p7 = scmp.lt.s32.totalorder %s928_s14, 3 }
   0xe   : > { %s1250_s19 = scalar_select %p997_p4, 1, 0 }
   0xf   : > { %s1251_s20 = scalar_select %p1002_p6, 1, 0 }
  0x10   : > { %p1007_p8 = pnand %p571_p5, %p111_p7  ;;  %s930_s22 = smov [#allocation7]  }
  0x11   : > { %s123_s23 = sshll.u32 %s930_s22, 4  ;;  %s31_s25 = sadd.s32 1, %s924_s13  ;;  %s124_s23 = int_to_ptr.vmem [resolvable:$true] %s123_s23 }
  0x12   : > { %s1252_s21 = scalar_select %p1007_p8, 1, 0 }
  0x13   : > { %p712_p9 = pneg %p1007_p8  ;;  %s784_s28 = scalar_lea.hbm %s1242_s1, 2048 }
  0x14   : > { %p785_p12 = scmp.ne.s32.totalorder %s1242_s1, %s784_s28  ;;  %p791_p5 = scmp.lt.u32.totalorder %s784_s28, %s1242_s1 }
  0x15   : > { %p1016_p11 = pnand %p712_p9, %p987_p1 }
  0x17   : > { %p786_p13 = pneg %p1016_p11 }
  0x19   : > { %p787_p0 = pnand %p786_p13, %p785_p12 }
  0x1b   : > { %p788_p3 = pneg %p787_p0 }
  0x1d   : > { %p793_p7 = pnand %p791_p5, %p788_p3 }
  0x1f   : > { %796 = shalt.err (!%p793_p7)
}
  0x20   : > { %s797_s5 = scalar_lea.vmem %s124_s23, 2048  ;;  %p805_p1 = scmp.lt.s32.totalorder %s124_s23, %s124_s23 }
  0x21   : > { %p798_p9 = scmp.ne.s32.totalorder %s124_s23, %s797_s5  ;;  %p806_p4 = scmp.lt.s32.totalorder %s797_s5, %s797_s5 }
  0x23   : > { %p800_p10 = pnand %p798_p9, %p786_p13  ;;  %p807_p8 = por %p806_p4, %p805_p1 }
  0x25   : > { %p801_p6 = pneg %p800_p10 }
  0x27   : > { %p808_p2 = pnand %p807_p8, %p801_p6 }
  0x29   : > { %811 = shalt.err (!%p808_p2)
}
  0x2a   : > { %s931_s6 = smov 128   ;;  %s932_s7 = smov 8  }
  0x2b   : > { %715 = dma.hbm_to_vmem [thread:$0]  (!%p1016_p11), %s1242_s1, 2048, %s124_s23, [#allocation8], %s931_s6, %s931_s6, %s932_s7  }
  0x2c   : > { %p33_p1 = scmp.ge.s32.totalorder %s31_s25, 2  ;;  %s40_s16 = sadd.s32 1, %s916_s11 }
  0x2d   : > { %p47_p2 = scmp.ne.s32.totalorder %s916_s11, %s912_s10  ;;  %p48_p4 = scmp.eq.s32.totalorder %s928_s14, 0 }
  0x2e   : > { %s1269_s25 = smov (%p33_p1, %s31_s25), 0  ;;  %p1255_p8 = scmp.ne.s32.totalorder %s1249_s18, 0 }
  0x2f   : > { %p1046_p6 = por %p48_p4, %p47_p2  ;;  %s35_s26 = ssub.s32 %s924_s13, %s1269_s25 }
  0x30   : > { %p1052_p10 = por %p1255_p8, %p47_p2  ;;  %p725_p12 = scmp.lt.s32.totalorder %s928_s14, 2 }
  0x31   : > { %p38_p11 = scmp.eq.s32.totalorder %s35_s26, 0  ;;  %s137_s23 = sand.u32 1, %s916_s11  }
  0x32   : > { %s574_s27 = sshll.u32 %s137_s23, 6  ;;  %s586_s29 = sshll.u32 %s924_s13, 10 }
  0x33   : > { %s1061_s28 = scalar_select %p38_p11, %s916_s11, %s40_s16  }
  0x34   : > { %s1067_s4 = scalar_lea.hbm %s1241_s0, %s586_s29  ;;  %s141_s18 = scalar_lea.vmem [#allocation4], %s574_s27 }
  0x35   : > { %s150_s5 = sshll.u32 %s141_s18, 4  ;;  %p1073_p13 = pnand %p725_p12, %p1046_p6  ;;  %s1069_s5 = int_to_ptr.vmem [resolvable:$true] %s150_s5 }
  0x36   : > { %s1077_s15 = scalar_lea.sflag [#allocation5], %s137_s23  ;;  %s812_s16 = scalar_lea.hbm %s1067_s4, 1024 }
  0x37   : > { %p813_p0 = scmp.ne.s32.totalorder %s1067_s4, %s812_s16  ;;  %p814_p3 = pneg %p1073_p13 }
  0x38   : > { %s817_s22 = scalar_lea.hbm %s1241_s0, 2048  ;;  %p818_p9 = scmp.lt.u32.totalorder %s1067_s4, %s1241_s0 }
  0x39   : > { %p815_p5 = pnand %p814_p3, %p813_p0  ;;  %p819_p1 = scmp.lt.u32.totalorder %s817_s22, %s812_s16 }
  0x3a   : > { %p821_p4 = scmp.lt.u32.totalorder %s812_s16, %s1067_s4 }
  0x3b   : > { %p816_p7 = pneg %p815_p5  ;;  %p820_p2 = por %p819_p1, %p818_p9 }
  0x3d   : > { %p822_p6 = por %p821_p4, %p820_p2 }
  0x3f   : > { %p823_p8 = pnand %p822_p6, %p816_p7 }
  0x41   : > { %826 = shalt.err (!%p823_p8)
}
  0x42   : > { %s827_s23 = scalar_lea.vmem %s1069_s5, 1024  ;;  %s933_s3 = smov [#allocation4]  }
  0x43   : > { %p828_p12 = scmp.ne.s32.totalorder %s1069_s5, %s827_s23  ;;  %s832_s18 = sshll.u32 %s933_s3, 4  ;;  %s833_s18 = int_to_ptr.vmem [resolvable:$false] %s832_s18 }
  0x44   : > { %s834_s26 = scalar_lea.vmem %s833_s18, 2048  ;;  %p835_p5 = scmp.lt.s32.totalorder %s1069_s5, %s833_s18 }
  0x45   : > { %p830_p11 = pnand %p828_p12, %p814_p3  ;;  %p836_p9 = scmp.lt.s32.totalorder %s834_s26, %s827_s23 }
  0x47   : > { %p831_p0 = pneg %p830_p11  ;;  %p837_p1 = por %p836_p9, %p835_p5 }
  0x49   : > { %p838_p2 = pnand %p837_p1, %p831_p0 }
  0x4b   : > { %841 = shalt.err (!%p838_p2)
}
  0x4c   : > { %719 = dma.hbm_to_vmem [thread:$0]  (!%p1073_p13), %s1067_s4, 1024, %s1069_s5, %s1077_s15, %s931_s6, %s931_s6, %s932_s7  }
  0x4d   : > { %p1258_p3 = scmp.ne.s32.totalorder %s1252_s21, 0 }
  0x4e   : > { %s1111_s16 = sand.u32 (!%p1258_p3), 1, %s912_s10   ;;  %p1259_p7 = scmp.ne.s32.totalorder (!%p1258_p3), %s1250_s19, 0 }
  0x4f   : > { %162 = sbr.rel (%p1258_p3) target bundleno = 424 (0x1a8), region = 28  ;;  %s578_s27 = sshll.u32 (!%p1258_p3), %s1111_s16, 6 }
  0x50   : > { %s165_s22 = scalar_lea.sflag (!%p1258_p3), [#allocation5], %s1111_s16  ;;  %s1117_s8 = scalar_lea.vmem (!%p1258_p3), [#allocation4], %s578_s27 }
  0x56   : > { %895 = dma.done.wait (%p1259_p7), %s165_s22, 1024  }
  0x57   : > { %897 = vsyncadd (%p1259_p7), %s165_s22, 4294966272  ;;  %p1260_p13 = scmp.ne.s32.totalorder %s1248_s17, 0 }
  0x59   : > { %899 = dma.done.wait (%p1260_p13), [#allocation8], 2048  }
  0x5a   : > { %901 = vsyncadd (%p1260_p13), [#allocation8], 4294965248  ;;  %v208_v0 = vld [vmem:[#allocation7] sm:$0xff]  ;;  %v209_v1 = vld [vmem:[#allocation7 + $0x8] sm:$0xff]  ;;  %v934_v32 = vmov 0.0   ;;  %s587_s17 = sshll.u32 %s920_s12, 10 }
  0x5b   : > { %v210_v2 = vld [vmem:[#allocation7 + $0x10] sm:$0xff]  ;;  %v656_v3 = vpack.c.bf16 %v209_v1, %v208_v0  ;;  %v211_v4 = vld [vmem:[#allocation7 + $0x18] sm:$0xff]  ;;  %v212_v6 = vld [vmem:[#allocation7 + $0x20] sm:$0xff]  ;;  %198 = vst [vmem:[#allocation2] sm:$0x1] %v934_v32  ;;  %s192_s19 = scalar_lea.vmem [#allocation9], %s578_s27  ;;  %s1185_s7 = scalar_lea.hbm %s1243_s2, %s587_s17 }
  0x5c   : > { %v660_v5 = vpack.c.bf16 %v211_v4, %v210_v2  ;;  %v213_v7 = vld [vmem:[#allocation7 + $0x28] sm:$0xff]  ;;  %v200_v9 = vld [vmem:[%s1117_s8] sm:$0xff]  ;;  %v214_v10 = vld [vmem:[#allocation7 + $0x30] sm:$0xff]  ;;  %199 = vst [vmem:[#allocation3] sm:$0x1] %v934_v32  ;;  %s473_s21 = sshll.u32 %s192_s19, 4  ;;  %s1187_s21 = int_to_ptr.vmem [resolvable:$true] %s473_s21 }
  0x5d   : > { %657 = vmatprep.subr.bf16.mxu0 %v656_v3  ;;  %688 = vmatprep.subr.bf16.mxu1 %v656_v3  ;;  %v664_v8 = vpack.c.bf16 %v213_v7, %v212_v6  ;;  %v215_v11 = vld [vmem:[#allocation7 + $0x38] sm:$0xff]  ;;  %v204_v12 = vld [vmem:[%s1117_s8 + $0x20] sm:$0xff]  ;;  %v217_v15 = vld [vmem:[#allocation7 + $0x48] sm:$0xff]  ;;  %s460_s4 = scalar_lea.sflag [#allocation6], %s1111_s16  ;;  %s842_s5 = scalar_lea.vmem %s1187_s21, 1024 }
  0x5e   : > { %659 = vmatpush3.bf16.msra.mxu0 %v656_v3  ;;  %696 = vmatpush3.bf16.msra.mxu1 %v656_v3  ;;  %v668_v13 = vpack.c.bf16 %v215_v11, %v214_v10  ;;  %v216_v14 = vld [vmem:[#allocation7 + $0x40] sm:$0xff]  ;;  %v218_v17 = vld [vmem:[#allocation7 + $0x50] sm:$0xff]  ;;  %v219_v18 = vld [vmem:[#allocation7 + $0x58] sm:$0xff]  ;;  %p843_p4 = scmp.ne.s32.totalorder %s1187_s21, %s842_s5  ;;  %s935_s15 = smov [#allocation9]  }
  0x5f   : > { %661 = vmatprep.subr.bf16.mxu0 %v660_v5  ;;  %689 = vmatprep.subr.bf16.mxu1 %v660_v5  ;;  %v672_v16 = vpack.c.bf16 %v217_v15, %v216_v14  ;;  %v676_v19 = vpack.c.bf16 %v219_v18, %v218_v17  ;;  %v220_v20 = vld [vmem:[#allocation7 + $0x60] sm:$0xff]  ;;  %v221_v21 = vld [vmem:[#allocation7 + $0x68] sm:$0xff]  ;;  %v222_v23 = vld [vmem:[#allocation7 + $0x70] sm:$0xff]  ;;  %s846_s29 = sshll.u32 %s935_s15, 4  ;;  %s847_s29 = int_to_ptr.vmem [resolvable:$false] %s846_s29 }
  0x60   : > { %644 = vmatprep.mubr.f32.mxu0 %v200_v9  ;;  %650 = vmatprep.mubr.f32.mxu1 %v204_v12  ;;  %v680_v22 = vpack.c.bf16 %v221_v21, %v220_v20  ;;  %v223_v24 = vld [vmem:[#allocation7 + $0x78] sm:$0xff]  ;;  %v201_v26 = vld [vmem:[%s1117_s8 + $0x8] sm:$0xff]  ;;  %v202_v28 = vld [vmem:[%s1117_s8 + $0x10] sm:$0xff]  ;;  %v400_v21 = vlaneseq  ;;  %p844_p6 = pnand %p843_p4, %p1052_p10  ;;  %s848_s30 = scalar_lea.vmem %s847_s29, 2048 }
  0x61   : > { %v684_v25 = vpack.c.bf16 %v223_v24, %v222_v23  ;;  %v205_v27 = vld [vmem:[%s1117_s8 + $0x28] sm:$0xff]  ;;  %v206_v29 = vld [vmem:[%s1117_s8 + $0x30] sm:$0xff]  ;;  %v203_v30 = vld [vmem:[%s1117_s8 + $0x18] sm:$0xff]  ;;  %p849_p12 = scmp.lt.s32.totalorder %s1187_s21, %s847_s29  ;;  %p850_p11 = scmp.lt.s32.totalorder %s848_s30, %s842_s5 }
  0x62   : > { %663 = vmatpush3.bf16.msra.mxu0 %v660_v5  ;;  %697 = vmatpush3.bf16.msra.mxu1 %v660_v5  ;;  %v207_v31 = vld [vmem:[%s1117_s8 + $0x38] sm:$0xff]  ;;  %v401_v24 = vshrl.u32 %v400_v21, 7  ;;  %p845_p8 = pneg %p844_p6 }
  0x63   : > { %665 = vmatprep.subr.bf16.mxu0 %v664_v8  ;;  %690 = vmatprep.subr.bf16.mxu1 %v664_v8  ;;  %v345_v11 = vld [vmem:[#allocation3] sm:$0x1]  ;;  %p851_p0 = por %p850_p11, %p849_p12 }
  0x65   : > { %p852_p5 = pnand %p851_p0, %p845_p8 }
  0x66   : > { %667 = vmatpush3.bf16.msra.mxu0 %v664_v8  ;;  %698 = vmatpush3.bf16.msra.mxu1 %v664_v8  ;;  %v329_v8 = vld [vmem:[#allocation2] sm:$0x1] }
  0x67   : > { %669 = vmatprep.subr.bf16.mxu0 %v668_v13  ;;  %691 = vmatprep.subr.bf16.mxu1 %v668_v13 }
  0x6a   : > { %671 = vmatpush3.bf16.msra.mxu0 %v668_v13  ;;  %699 = vmatpush3.bf16.msra.mxu1 %v668_v13 }
  0x6b   : > { %673 = vmatprep.subr.bf16.mxu0 %v672_v16  ;;  %692 = vmatprep.subr.bf16.mxu1 %v672_v16 }
  0x6e   : > { %675 = vmatpush3.bf16.msra.mxu0 %v672_v16  ;;  %700 = vmatpush3.bf16.msra.mxu1 %v672_v16 }
  0x6f   : > { %677 = vmatprep.subr.bf16.mxu0 %v676_v19  ;;  %693 = vmatprep.subr.bf16.mxu1 %v676_v19 }
  0x72   : > { %679 = vmatpush3.bf16.msra.mxu0 %v676_v19  ;;  %701 = vmatpush3.bf16.msra.mxu1 %v676_v19 }
  0x73   : > { %681 = vmatprep.subr.bf16.mxu0 %v680_v22  ;;  %694 = vmatprep.subr.bf16.mxu1 %v680_v22 }
  0x76   : > { %683 = vmatpush3.bf16.msra.mxu0 %v680_v22  ;;  %702 = vmatpush3.bf16.msra.mxu1 %v680_v22 }
  0x77   : > { %685 = vmatprep.subr.bf16.mxu0 %v684_v25  ;;  %695 = vmatprep.subr.bf16.mxu1 %v684_v25 }
  0x7a   : > { %687 = vmatpush3.bf16.msra.mxu0 %v684_v25  ;;  %703 = vmatpush3.bf16.msra.mxu1 %v684_v25  ;;  %v402_v25 = vsub.s32 0, %v401_v24 }
  0x7d   : > { %645 = vmatmul.mubr.f32.vlgmr.msra.gmra.mrb[0].mxu0 %v201_v26  ;;  %651 = vmatmul.mubr.f32.vlgmr.msra.gmra.mrb[0].mxu1 %v205_v27 }
  0x7e   : > { %647 = vmatprep.mubr.f32.mxu0 %v202_v28  ;;  %653 = vmatprep.mubr.f32.mxu1 %v206_v29 }
  0x81   : > { %648 = vmatmul.mubr.f32.gmra.mrb[2].mxu0 %v203_v30  ;;  %654 = vmatmul.mubr.f32.gmra.mrb[2].mxu1 %v207_v31 }
 0x150   : > { %v1135_v33 = vpop.f32.mrb[0].mxu0  ;;  %v1137_v34 = vpop.f32.mrb[0].mxu1 }
 0x151   : > { %v347_v35 = vmul.f32 %v1135_v33, %v1135_v33  ;;  %v1141_v36 = vpop.f32.mrb[1].mxu0  ;;  %v1143_v37 = vpop.f32.mrb[1].mxu1  ;;  %v351_v53 = vmul.f32 %v1137_v34, %v1137_v34 }
 0x152   : > { %v330_v38 = vadd.f32 %v1135_v33, %v1141_v36  ;;  %v346_v39 = vmul.f32 %v1141_v36, %v1141_v36  ;;  %v350_v50 = vmul.f32 %v1143_v37, %v1143_v37 }
 0x154   : > { %v354_v40 = vadd.f32 %v347_v35, %v346_v39  ;;  %v1149_v41 = vpop.f32.mrb[2].mxu0  ;;  %v1151_v42 = vpop.f32.mrb[2].mxu1 }
 0x155   : > { %v1153_v43 = vpop.f32.mrb[3].mxu0  ;;  %v320_v44 = vpop.f32.mrb[3].mxu1  ;;  %v349_v47 = vmul.f32 %v1149_v41, %v1149_v41  ;;  %v353_v59 = vmul.f32 %v1151_v42, %v1151_v42 }
 0x156   : > { %v331_v45 = vadd.f32 %v330_v38, %v1153_v43  ;;  %v348_v46 = vmul.f32 %v1153_v43, %v1153_v43  ;;  %v352_v56 = vmul.f32 %v320_v44, %v320_v44 }
 0x158   : > { %v332_v48 = vadd.f32 %v1149_v41, %v331_v45  ;;  %v355_v49 = vadd.f32 %v354_v40, %v348_v46 }
 0x15a   : > { %v356_v51 = vadd.f32 %v355_v49, %v349_v47  ;;  %v333_v52 = vadd.f32 %v332_v48, %v1143_v37 }
 0x15c   : > { %v357_v54 = vadd.f32 %v356_v51, %v350_v50  ;;  %v334_v55 = vadd.f32 %v1137_v34, %v333_v52 }
 0x15e   : > { %v335_v57 = vadd.f32 %v334_v55, %v320_v44  ;;  %v358_v58 = vadd.f32 %v357_v54, %v351_v53 }
 0x160   : > { %v336_v60 = vadd.f32 %v1151_v42, %v335_v57  ;;  %v359_v61 = vadd.f32 %v358_v58, %v352_v56 }
 0x162   : > { %v337_v62 = vrot.slane %v336_v60, 4  ;;  %v360_v63 = vadd.f32 %v359_v61, %v353_v59 }
 0x164   : > { %v338_v0 = vadd.f32 %v337_v62, %v336_v60  ;;  %v361_v1 = vrot.slane %v360_v63, 4 }
 0x166   : > { %v339_v2 = vrot.slane %v338_v0, 2  ;;  %v362_v3 = vadd.f32 %v361_v1, %v360_v63 }
 0x168   : > { %v340_v4 = vadd.f32 %v339_v2, %v338_v0  ;;  %v363_v5 = vrot.slane %v362_v3, 2 }
 0x16a   : > { %v341_v6 = vrot.slane %v340_v4, 1  ;;  %v364_v7 = vadd.f32 %v363_v5, %v362_v3 }
 0x16c   : > { %v342_v9 = vadd.f32 %v341_v6, %v340_v4  ;;  %v365_v10 = vrot.slane %v364_v7, 1 }
 0x16e   : > { %v343_v12 = vadd.f32 %v342_v9, %v329_v8  ;;  %v366_v13 = vadd.f32 %v365_v10, %v364_v7 }
 0x170   : > { %344 = vst [vmem:[#allocation2] sm:$0x1] %v343_v12  ;;  %v367_v14 = vadd.f32 %v366_v13, %v345_v11 }
 0x172   : > { %368 = vst [vmem:[#allocation3] sm:$0x1] %v367_v14 }
 0x177   : > { %v382_v15 = vld [vmem:[#allocation2] sm:$0x1] }
 0x178   : > { %v383_v16 = vmul.f32 0.015625, %v382_v15 }
 0x179   : > { %v384_v17 = vld [vmem:[#allocation3] sm:$0x1] }
 0x17a   : > { %v385_v18 = vmul.f32 0.015625, %v384_v17  ;;  %v386_v19 = vmul.f32 %v383_v16, %v383_v16  ;;  %v403_v26 = vrot.slane %v383_v16, %v402_v25 }
 0x17c   : > { %v387_v20 = vsub.f32 %v385_v18, %v386_v19  ;;  %v411_v28 = vsub.f32 %v320_v44, %v403_v26  ;;  %v405_v30 = vsub.f32 %v1141_v36, %v403_v26  ;;  %v406_v31 = vsub.f32 %v1135_v33, %v403_v26 }
 0x17d   : > { %v407_v32 = vsub.f32 %v1153_v43, %v403_v26  ;;  %v408_v35 = vsub.f32 %v1149_v41, %v403_v26  ;;  %v409_v38 = vsub.f32 %v1143_v37, %v403_v26  ;;  %v410_v39 = vsub.f32 %v1137_v34, %v403_v26 }
 0x17e   : > { %v388_v22 = vmax.f32 %v387_v20, 0.0  ;;  %v412_v40 = vsub.f32 %v1151_v42, %v403_v26 }
 0x180   : > { %v389_v23 = vadd.f32 1e-05, %v388_v22 }
 0x182   : > { %782 = vrsqrt.f32 %v389_v23 }
 0x18c   : > { %v783_v27 = vpop.eup %782 }
 0x18d   : > { %v417_v29 = vrot.slane %v783_v27, %v402_v25 }
 0x18f   : > { %v425_v45 = vmul.f32 %v417_v29, %v411_v28  ;;  %v419_v46 = vmul.f32 %v417_v29, %v405_v30  ;;  %v420_v44 = vmul.f32 %v417_v29, %v406_v31  ;;  %v421_v47 = vmul.f32 %v417_v29, %v407_v32 }
 0x190   : > { %v422_v48 = vmul.f32 %v417_v29, %v408_v35  ;;  %v423_v36 = vmul.f32 %v417_v29, %v409_v38  ;;  %v424_v49 = vmul.f32 %v417_v29, %v410_v39  ;;  %v426_v33 = vmul.f32 %v417_v29, %v412_v40 }
 0x191   : > { %vm433_vm0 = vcmp.ge.f32.partialorder %v425_v45, 0.0  ;;  %v441_v43 = vmul.f32 0.2, %v425_v45  ;;  %vm427_vm1 = vcmp.ge.f32.partialorder %v419_v46, 0.0  ;;  %vm428_vm2 = vcmp.ge.f32.partialorder %v420_v44, 0.0 }
 0x192   : > { %vm429_vm3 = vcmp.ge.f32.partialorder %v421_v47, 0.0  ;;  %vm430_vm4 = vcmp.ge.f32.partialorder %v422_v48, 0.0  ;;  %vm431_vm5 = vcmp.ge.f32.partialorder %v423_v36, 0.0  ;;  %vm432_vm6 = vcmp.ge.f32.partialorder %v424_v49, 0.0 }
 0x193   : > { %v449_v34 = vsel %vm433_vm0, %v425_v45, %v441_v43  ;;  %vm434_vm7 = vcmp.ge.f32.partialorder %v426_v33, 0.0  ;;  %v435_v37 = vmul.f32 0.2, %v419_v46  ;;  %v436_v41 = vmul.f32 0.2, %v420_v44 }
 0x194   : > { %457 = vst [vmem:[%s192_s19 + $0x30] sm:$0xff] %v449_v34  ;;  %v437_v42 = vmul.f32 0.2, %v421_v47  ;;  %v438_v50 = vmul.f32 0.2, %v422_v48 }
 0x195   : > { %v439_v51 = vmul.f32 0.2, %v423_v36  ;;  %v440_v52 = vmul.f32 0.2, %v424_v49  ;;  %v442_v53 = vmul.f32 0.2, %v426_v33  ;;  %v443_v54 = vsel %vm427_vm1, %v419_v46, %v435_v37 }
 0x196   : > { %v444_v55 = vsel %vm428_vm2, %v420_v44, %v436_v41  ;;  %v445_v56 = vsel %vm429_vm3, %v421_v47, %v437_v42  ;;  %v446_v57 = vsel %vm430_vm4, %v422_v48, %v438_v50  ;;  %451 = vst [vmem:[%s192_s19] sm:$0xff] %v443_v54 }
 0x197   : > { %v447_v58 = vsel %vm431_vm5, %v423_v36, %v439_v51  ;;  %452 = vst [vmem:[%s192_s19 + $0x8] sm:$0xff] %v444_v55  ;;  %v448_v59 = vsel %vm432_vm6, %v424_v49, %v440_v52  ;;  %v450_v60 = vsel %vm434_vm7, %v426_v33, %v442_v53  ;;  %453 = vst [vmem:[%s192_s19 + $0x10] sm:$0xff] %v445_v56 }
 0x198   : > { %454 = vst [vmem:[%s192_s19 + $0x18] sm:$0xff] %v446_v57  ;;  %455 = vst [vmem:[%s192_s19 + $0x20] sm:$0xff] %v447_v58 }
 0x199   : > { %456 = vst [vmem:[%s192_s19 + $0x28] sm:$0xff] %v448_v59  ;;  %458 = vst [vmem:[%s192_s19 + $0x38] sm:$0xff] %v450_v60 }
 0x19a   : > { %855 = shalt.err (!%p852_p5)
}
 0x19b   : > { %s856_s23 = scalar_lea.hbm %s1185_s7, 1024  ;;  %s860_s26 = scalar_lea.hbm %s1243_s2, 2048 }
 0x19c   : > { %p857_p9 = scmp.ne.s32.totalorder %s1185_s7, %s856_s23  ;;  %p861_p3 = scmp.lt.u32.totalorder %s1185_s7, %s1243_s2 }
 0x19d   : > { %p862_p7 = scmp.lt.u32.totalorder %s860_s26, %s856_s23  ;;  %p864_p4 = scmp.lt.u32.totalorder %s856_s23, %s1185_s7 }
 0x19e   : > { %p858_p1 = pnand %p857_p9, %p1052_p10 }
 0x19f   : > { %p863_p13 = por %p862_p7, %p861_p3 }
 0x1a0   : > { %p859_p2 = pneg %p858_p1 }
 0x1a1   : > { %p865_p6 = por %p864_p4, %p863_p13 }
 0x1a3   : > { %p866_p8 = pnand %p865_p6, %p859_p2 }
 0x1a5   : > { %869 = shalt.err (!%p866_p8)
}
 0x1a6   : > { %s936_s8 = smov 128   ;;  %s937_s17 = smov 8  }
 0x1a7   : > { %710 = dma.vmem_to_hbm [thread:$0]  (%p1052_p10), %s1187_s21, 1024, %s1185_s7, %s460_s4, %s936_s8, %s936_s8, %s937_s17  }
 0x1a8 PF: > { %s488_s19 = sand.u32 1, %s908_s9   ;;  %p1261_p12 = scmp.ne.s32.totalorder %s1251_s20, 0 }
 0x1a9   : > { %p1262_p11 = scmp.ge.s32.totalorder %s928_s14, 2  ;;  %s489_s6 = scalar_lea.sflag [#allocation6], %s488_s19 }
 0x1ab   : > { %p721_p0 = pnand %p1262_p11, %p1261_p12 }
 0x1ad   : > { %903 = dma.done.wait (!%p721_p0), %s489_s6, 1024  }
 0x1ae   : > { %905 = vsyncadd (!%p721_p0), %s489_s6, 4294966272  ;;  %s19_s14 = sadd.s32 1, %s928_s14   ;;  %s1263_s9 = smov %s912_s10 }
 0x1af   : > { %p16_p5 = scmp.ge.s32.totalorder %s19_s14, 4   ;;  %s1264_s10 = smov %s916_s11 }
 0x1b0   : > { %s1265_s11 = smov %s1061_s28  ;;  %s1266_s12 = smov %s924_s13 }
 0x1b1   : > { %s1267_s13 = smov %s1269_s25  ;;  %18 = sbr.rel (!%p16_p5) target bundleno = 7 (0x7), region = 86 }
 0x1b8   :  { %494 = vsyncpa [#allocation5], 1 }
 0x1b9   :  { %496 = vsyncpa [#allocation5 + $0x1], 1 }
 0x1ba   :  { %497 = vsyncpa [#allocation8], 1 }
 0x1bb   :  { %498 = vsyncpa [#allocation6], 1 }
 0x1bc   :  { %500 = vsyncpa [#allocation6 + $0x1], 1 }

</bundles_post_ra>
